<compile_context>
chip_gen: v5e
topology: v5e:2x2
jax: 0.10.0
libtpu: 0.0.40
codegen_flags: <defaults>
</compile_context>

<pallas_src>
import functools

import jax
import jax.numpy as jnp
from jax.experimental import pallas as pl
from jax.experimental.pallas import tpu as pltpu

_LANE = 128            # last-dim (lane) alignment for weights / hidden activations
_ROW_ALIGN = 16        # sublane alignment for bf16 row tiles
_HEADROOM = 8 << 20    # compiler-internal scratch headroom
_MIN_SPLIT_ROWS = 128  # only force >=2 row tiles when each tile keeps >=128 rows


def _round_up(x, m):
    return (x + m - 1) // m * m


def _cdiv(a, b):
    return -(-a // b)


def _vmem_capacity_bytes():
    try:
        return int(pltpu.get_tpu_info().vmem_capacity_bytes)
    except Exception:
        return 64 * 1024 * 1024   # conservative: v7x per-TensorCore VMEM


# --------------------------------------------------------------------------
# Kernel: one row-tile of the activation runs through every layer in-kernel.
# refs = (w0, b0, w1, b1, ..., w_{L-1}, b_{L-1}, o_ref)
# --------------------------------------------------------------------------
def _fused_mlp_kernel(x_ref, *refs, num_layers, compute_dtype):
    o_ref = refs[-1]
    act = x_ref[...].astype(compute_dtype)            # cast in-kernel (no wrapper pass)
    for i in range(num_layers):
        w = refs[2 * i][...]                           # (K_i, N_i), pre-transposed bf16
        b = refs[2 * i + 1][...]                       # (1, N_i), f32
        acc = jnp.dot(act, w, preferred_element_type=jnp.float32) + b
        if i < num_layers - 1:
            acc = jnp.clip(acc, 0.0, 6.0)              # F.relu6 in f32
            act = acc.astype(compute_dtype)            # stays in VMEM, no HBM trip
        else:
            o_ref[...] = acc.astype(o_ref.dtype)


# --------------------------------------------------------------------------
# Parameter init (mimics nn.Linear init) and one-time layout preparation.
# --------------------------------------------------------------------------
def init_mlp_params(key, input_dim, hidden_dim, output_dim, num_layers,
                    dtype=jnp.float32):
    h = [hidden_dim] * (num_layers - 1)
    dims_in = [input_dim] + h
    dims_out = h + [output_dim]
    params = []
    for n_in, n_out in zip(dims_in, dims_out):
        key, kw, kb = jax.random.split(key, 3)
        bound = 1.0 / (n_in ** 0.5)
        w = jax.random.uniform(kw, (n_out, n_in), dtype, -bound, bound)
        b = jax.random.uniform(kb, (n_out,), dtype, -bound, bound)
        params.append((w, b))
    return params


def prepare_mlp_params(params, compute_dtype=jnp.bfloat16):
    """One-time: transpose to (in, out), zero-pad lanes to 128, cast to bf16.

    Layer 0 keeps its K dim unpadded so x can be streamed in its native width;
    deeper layers pad K to match the previous layer's padded N (exact: the
    padded activation columns are zero).
    """
    prepared = []
    prev_np = None
    for li, (w, b) in enumerate(params):
        n_out, n_in = w.shape
        kp = n_in if li == 0 else prev_np
        assert kp >= n_in
        np_ = _round_up(n_out, _LANE)
        w_t = jnp.transpose(w)                                        # once, not per call
        w_t = jnp.pad(w_t, ((0, kp - n_in), (0, np_ - n_out)))
        b_p = jnp.pad(b, (0, np_ - n_out)).reshape(1, np_).astype(jnp.float32)
        prepared.append((w_t.astype(compute_dtype), b_p))
        prev_np = np_
    return prepared


# --------------------------------------------------------------------------
# Wrapper: size the row tile against the VMEM budget, launch one fused
# pallas_call, slice the real output back out.
# --------------------------------------------------------------------------
def mlp_forward_pallas(x, prepared, output_dim, *,
                       compute_dtype=jnp.bfloat16, block_m=512,
                       single_buffer_weights=True):
    lead_shape = x.shape[:-1]
    x2d = x.reshape(-1, x.shape[-1])
    m, k_in = x2d.shape
    num_layers = len(prepared)
    assert prepared[0][0].shape[0] == k_in, "input feature dim mismatch"
    n_pad = prepared[-1][0].shape[1]
    out_dtype = x.dtype

    # ---- per-generation VMEM budget ------------------------------------
    cap = _vmem_capacity_bytes()
    vmem_limit = int(cap * 0.85)          # raise the scoped limit well above default
    budget = vmem_limit - _HEADROOM       # what our tiles/weights may use

    itemsize_c = jnp.dtype(compute_dtype).itemsize
    itemsize_x = jnp.dtype(x2d.dtype).itemsize
    itemsize_o = jnp.dtype(out_dtype).itemsize
    weight_bytes = sum(w.size * w.dtype.itemsize + b.size * b.dtype.itemsize
                      for w, b in prepared)
    max_feat = max(w.shape[1] for w, _ in prepared)
    wbuf = 1 if single_buffer_weights else 2

    def vmem_est(bm_):
        return (wbuf * weight_bytes                      # resident weights + biases
                + 2 * bm_ * k_in * itemsize_x            # input tile, double-buffered
                + 2 * bm_ * n_pad * itemsize_o           # output tile, double-buffered
                + 2 * bm_ * max_feat * 4                 # f32 acc + live prev activation
                + bm_ * max_feat * itemsize_c)           # bf16-cast activation

    # ---- choose row tile: biggest that fits, no nearly-empty last tile --
    bm = min(block_m, _round_up(m, _ROW_ALIGN))
    while bm > _ROW_ALIGN and vmem_est(bm) > budget:
        bm = max(_round_up(bm // 2, _ROW_ALIGN), _ROW_ALIGN)
    if vmem_est(bm) > budget:
        raise ValueError(
            f"fused MLP needs ~{vmem_est(bm)} B VMEM (budget {budget} B); "
            "layers too large for the resident-weight path — needs K/N tiling")

    n_tiles = _cdiv(m, bm)
    if n_tiles == 1 and m >= 2 * _MIN_SPLIT_ROWS:
        n_tiles = 2                         # keep v7x's 2nd TensorCore busy
    bm = _round_up(_cdiv(m, n_tiles), _ROW_ALIGN)   # rebalance -> small remainder
    m_pad = n_tiles * bm

    # Only the (small) row remainder is padded; no feature-dim pad, no wrapper cast.
    if m_pad != m:
        x2d = jnp.pad(x2d, ((0, m_pad - m), (0, 0)))

    kernel = functools.partial(_fused_mlp_kernel,
                               num_layers=num_layers,
                               compute_dtype=compute_dtype)

    in_specs = [pl.BlockSpec((bm, k_in), lambda i: (i, 0))]
    weight_kwargs = (
        {"pipeline_mode": pl.Buffered(1)} if single_buffer_weights else {})
    for w_t, b_p in prepared:
        kp, np_ = w_t.shape
        # Constant index maps -> weights/bias DMA'd once, resident across tiles;
        # single-buffered since they are grid-invariant.
        in_specs.append(pl.BlockSpec((kp, np_), lambda i: (0, 0), **weight_kwargs))
        in_specs.append(pl.BlockSpec((1, np_), lambda i: (0, 0), **weight_kwargs))

    flat_params = [t for pair in prepared for t in pair]

    out = pl.pallas_call(
        kernel,
        out_shape=jax.ShapeDtypeStruct((m_pad, n_pad), out_dtype),
        grid_spec=pltpu.PrefetchScalarGridSpec(
            num_scalar_prefetch=0,
            grid=(n_tiles,),
            in_specs=in_specs,
            out_specs=pl.BlockSpec((bm, n_pad), lambda i: (i, 0)),
        ),
        compiler_params=pltpu.CompilerParams(
            dimension_semantics=("parallel",),   # row tiles independent (v7x 2xTC)
            vmem_limit_bytes=vmem_limit,
        ),
    )(x2d, *flat_params)

    return out[:m, :output_dim].reshape(*lead_shape, output_dim)


# --------------------------------------------------------------------------
# References
# --------------------------------------------------------------------------
def mlp_reference_f32(x, params):
    num_layers = len(params)
    for i, (w, b) in enumerate(params):
        x = x @ w.T + b
        if i < num_layers - 1:
            x = jnp.clip(x, 0.0, 6.0)
    return x


def mlp_reference_lowp(x, params, compute_dtype=jnp.bfloat16):
    """Same math as the kernel (bf16 operands, f32 accumulation/epilogue)."""
    num_layers = len(params)
    act = x.astype(compute_dtype)
    out = None
    for i, (w, b) in enumerate(params):
        acc = jnp.dot(act, jnp.transpose(w).astype(compute_dtype),
                      preferred_element_type=jnp.float32)
        acc = acc + b.astype(jnp.float32)
        if i < num_layers - 1:
            act = jnp.clip(acc, 0.0, 6.0).astype(compute_dtype)
        else:
            out = acc.astype(x.dtype)
    return out


if __name__ == "__main__":
    key = jax.random.PRNGKey(0)
    k_x, k_p = jax.random.split(key)

    batch, seq = 2, 8
    input_dim, hidden_dim, output_dim, num_layers = 32, 64, 16, 3

    x = jax.random.normal(k_x, (batch, seq, input_dim), jnp.float32)
    params = init_mlp_params(k_p, input_dim, hidden_dim, output_dim, num_layers)

    # One-time weight layout prep (transpose + lane-pad + bf16 cast).
    prepared = prepare_mlp_params(params, compute_dtype=jnp.bfloat16)

    @functools.partial(jax.jit, static_argnames=("single_buffer_weights",))
    def run(x, prepared, single_buffer_weights=True):
        return mlp_forward_pallas(x, prepared, output_dim,
                                  single_buffer_weights=single_buffer_weights)

    try:
        out = jax.block_until_ready(run(x, prepared, single_buffer_weights=True))
    except Exception:
        # Fallback if this runtime rejects pl.Buffered(1) single-buffering.
        out = jax.block_until_ready(run(x, prepared, single_buffer_weights=False))

    assert out.shape == (batch, seq, output_dim), out.shape

    ref_lowp = mlp_reference_lowp(x, params)          # same-precision reference
    ref_f32 = mlp_reference_f32(x, params)            # module semantics in f32

    assert jnp.allclose(out, ref_lowp, atol=2e-2, rtol=2e-2), \
        float(jnp.max(jnp.abs(out - ref_lowp)))
    assert jnp.allclose(out, ref_f32, atol=1e-1, rtol=5e-2), \
        float(jnp.max(jnp.abs(out - ref_f32)))

    print("KERNEL_OK")
</pallas_src>

<mosaic_0001>
module attributes {stable_mosaic.version = 11 : i64} {
  func.func @_fused_mlp_kernel(%arg0: i32, %arg1: memref<16x32xf32, #tpu.memory_space<vmem>>, %arg2: memref<32x128xbf16, #tpu.memory_space<vmem>>, %arg3: memref<1x128xf32, #tpu.memory_space<vmem>>, %arg4: memref<128x128xbf16, #tpu.memory_space<vmem>>, %arg5: memref<1x128xf32, #tpu.memory_space<vmem>>, %arg6: memref<128x128xbf16, #tpu.memory_space<vmem>>, %arg7: memref<1x128xf32, #tpu.memory_space<vmem>>, %arg8: memref<16x128xf32, #tpu.memory_space<vmem>>) attributes {dimension_semantics = [#tpu.dimension_semantics<parallel>], iteration_bounds = array<i64: 1>, scalar_prefetch = 0 : i64, scratch_operands = 0 : i64, tpu.core_type = #tpu.core_type<tc>, window_params = [{transform_indices = @transform_0, window_bounds = array<i64: 16, 32>}, {pipeline_mode = #tpu.pipeline_mode<synchronous>, transform_indices = @transform_1, window_bounds = array<i64: 32, 128>}, {pipeline_mode = #tpu.pipeline_mode<synchronous>, transform_indices = @transform_2, window_bounds = array<i64: 1, 128>}, {pipeline_mode = #tpu.pipeline_mode<synchronous>, transform_indices = @transform_3, window_bounds = array<i64: 128, 128>}, {pipeline_mode = #tpu.pipeline_mode<synchronous>, transform_indices = @transform_4, window_bounds = array<i64: 1, 128>}, {pipeline_mode = #tpu.pipeline_mode<synchronous>, transform_indices = @transform_5, window_bounds = array<i64: 128, 128>}, {pipeline_mode = #tpu.pipeline_mode<synchronous>, transform_indices = @transform_6, window_bounds = array<i64: 1, 128>}, {transform_indices = @transform_7, window_bounds = array<i64: 16, 128>}]} {
    %c0 = arith.constant 0 : index
    %c0_0 = arith.constant 0 : index
    %0 = vector.load %arg1[%c0, %c0_0] : memref<16x32xf32, #tpu.memory_space<vmem>>, vector<16x32xf32>
    %1 = arith.truncf %0 : vector<16x32xf32> to vector<16x32xbf16>
    %c0_1 = arith.constant 0 : index
    %c0_2 = arith.constant 0 : index
    %2 = vector.load %arg2[%c0_1, %c0_2] : memref<32x128xbf16, #tpu.memory_space<vmem>>, vector<32x128xbf16>
    %c0_3 = arith.constant 0 : index
    %c0_4 = arith.constant 0 : index
    %3 = vector.load %arg3[%c0_3, %c0_4] : memref<1x128xf32, #tpu.memory_space<vmem>>, vector<1x128xf32>
    %cst = arith.constant dense<0.000000e+00> : vector<16x128xf32>
    %4 = tpu.matmul %1, %2, %cst {dimension_numbers = #tpu.dot_dimension_numbers<[1], [0], [0], [1], [0, 0, 1, 1], [], []>} : vector<16x32xbf16>, vector<32x128xbf16>, vector<16x128xf32> -> vector<16x128xf32>
    %5 = vector.broadcast %3 : vector<1x128xf32> to vector<16x128xf32>
    %6 = arith.addf %4, %5 : vector<16x128xf32>
    %cst_5 = arith.constant 0.000000e+00 : f32
    %cst_6 = arith.constant 6.000000e+00 : f32
    %7 = vector.broadcast %cst_5 : f32 to vector<16x128xf32>
    %8 = arith.maximumf %7, %6 : vector<16x128xf32>
    %9 = vector.broadcast %cst_6 : f32 to vector<16x128xf32>
    %10 = arith.minimumf %9, %8 : vector<16x128xf32>
    %11 = arith.truncf %10 : vector<16x128xf32> to vector<16x128xbf16>
    %c0_7 = arith.constant 0 : index
    %c0_8 = arith.constant 0 : index
    %12 = vector.load %arg4[%c0_7, %c0_8] : memref<128x128xbf16, #tpu.memory_space<vmem>>, vector<128x128xbf16>
    %c0_9 = arith.constant 0 : index
    %c0_10 = arith.constant 0 : index
    %13 = vector.load %arg5[%c0_9, %c0_10] : memref<1x128xf32, #tpu.memory_space<vmem>>, vector<1x128xf32>
    %cst_11 = arith.constant dense<0.000000e+00> : vector<16x128xf32>
    %14 = tpu.matmul %11, %12, %cst_11 {dimension_numbers = #tpu.dot_dimension_numbers<[1], [0], [0], [1], [0, 0, 1, 1], [], []>} : vector<16x128xbf16>, vector<128x128xbf16>, vector<16x128xf32> -> vector<16x128xf32>
    %15 = vector.broadcast %13 : vector<1x128xf32> to vector<16x128xf32>
    %16 = arith.addf %14, %15 : vector<16x128xf32>
    %cst_12 = arith.constant 0.000000e+00 : f32
    %cst_13 = arith.constant 6.000000e+00 : f32
    %17 = vector.broadcast %cst_12 : f32 to vector<16x128xf32>
    %18 = arith.maximumf %17, %16 : vector<16x128xf32>
    %19 = vector.broadcast %cst_13 : f32 to vector<16x128xf32>
    %20 = arith.minimumf %19, %18 : vector<16x128xf32>
    %21 = arith.truncf %20 : vector<16x128xf32> to vector<16x128xbf16>
    %c0_14 = arith.constant 0 : index
    %c0_15 = arith.constant 0 : index
    %22 = vector.load %arg6[%c0_14, %c0_15] : memref<128x128xbf16, #tpu.memory_space<vmem>>, vector<128x128xbf16>
    %c0_16 = arith.constant 0 : index
    %c0_17 = arith.constant 0 : index
    %23 = vector.load %arg7[%c0_16, %c0_17] : memref<1x128xf32, #tpu.memory_space<vmem>>, vector<1x128xf32>
    %cst_18 = arith.constant dense<0.000000e+00> : vector<16x128xf32>
    %24 = tpu.matmul %21, %22, %cst_18 {dimension_numbers = #tpu.dot_dimension_numbers<[1], [0], [0], [1], [0, 0, 1, 1], [], []>} : vector<16x128xbf16>, vector<128x128xbf16>, vector<16x128xf32> -> vector<16x128xf32>
    %25 = vector.broadcast %23 : vector<1x128xf32> to vector<16x128xf32>
    %26 = arith.addf %24, %25 : vector<16x128xf32>
    %c0_19 = arith.constant 0 : index
    %c0_20 = arith.constant 0 : index
    %27 = vector.load %arg8[%c0_19, %c0_20] : memref<16x128xf32, #tpu.memory_space<vmem>>, vector<16x128xf32>
    tpu.vector_store %arg8[%c0_19, %c0_20], %26 {strides = array<i32>} : memref<16x128xf32, #tpu.memory_space<vmem>>, vector<16x128xf32>,
    return
  }
  func.func @transform_0(%arg0: i32) -> (i32, i32) {
    %c0_i32 = arith.constant 0 : i32
    %c0_i32_0 = arith.constant 0 : i32
    return %arg0, %c0_i32 : i32, i32
  }
  func.func @transform_1(%arg0: i32) -> (i32, i32) {
    %c0_i32 = arith.constant 0 : i32
    %c0_i32_0 = arith.constant 0 : i32
    %c0_i32_1 = arith.constant 0 : i32
    return %c0_i32, %c0_i32_0 : i32, i32
  }
  func.func @transform_2(%arg0: i32) -> (i32, i32) {
    %c0_i32 = arith.constant 0 : i32
    %c0_i32_0 = arith.constant 0 : i32
    %c0_i32_1 = arith.constant 0 : i32
    return %c0_i32, %c0_i32_0 : i32, i32
  }
  func.func @transform_3(%arg0: i32) -> (i32, i32) {
    %c0_i32 = arith.constant 0 : i32
    %c0_i32_0 = arith.constant 0 : i32
    %c0_i32_1 = arith.constant 0 : i32
    return %c0_i32, %c0_i32_0 : i32, i32
  }
  func.func @transform_4(%arg0: i32) -> (i32, i32) {
    %c0_i32 = arith.constant 0 : i32
    %c0_i32_0 = arith.constant 0 : i32
    %c0_i32_1 = arith.constant 0 : i32
    return %c0_i32, %c0_i32_0 : i32, i32
  }
  func.func @transform_5(%arg0: i32) -> (i32, i32) {
    %c0_i32 = arith.constant 0 : i32
    %c0_i32_0 = arith.constant 0 : i32
    %c0_i32_1 = arith.constant 0 : i32
    return %c0_i32, %c0_i32_0 : i32, i32
  }
  func.func @transform_6(%arg0: i32) -> (i32, i32) {
    %c0_i32 = arith.constant 0 : i32
    %c0_i32_0 = arith.constant 0 : i32
    %c0_i32_1 = arith.constant 0 : i32
    return %c0_i32, %c0_i32_0 : i32, i32
  }
  func.func @transform_7(%arg0: i32) -> (i32, i32) {
    %c0_i32 = arith.constant 0 : i32
    %c0_i32_0 = arith.constant 0 : i32
    return %arg0, %c0_i32 : i32, i32
  }
}

module attributes {stable_mosaic.version = 11 : i64} {
  func.func @_fused_mlp_kernel(%arg0: i32, %arg1: memref<16x32xf32, #tpu.memory_space<vmem>>, %arg2: memref<32x128xbf16, #tpu.memory_space<vmem>>, %arg3: memref<1x128xf32, #tpu.memory_space<vmem>>, %arg4: memref<128x128xbf16, #tpu.memory_space<vmem>>, %arg5: memref<1x128xf32, #tpu.memory_space<vmem>>, %arg6: memref<128x128xbf16, #tpu.memory_space<vmem>>, %arg7: memref<1x128xf32, #tpu.memory_space<vmem>>, %arg8: memref<16x128xf32, #tpu.memory_space<vmem>>) attributes {dimension_semantics = [#tpu.dimension_semantics<parallel>], iteration_bounds = array<i64: 1>, scalar_prefetch = 0 : i64, scratch_operands = 0 : i64, tpu.core_type = #tpu.core_type<tc>, window_params = [{transform_indices = @transform_0, window_bounds = array<i64: 16, 32>}, {pipeline_mode = #tpu.pipeline_mode<synchronous>, transform_indices = @transform_1, window_bounds = array<i64: 32, 128>}, {pipeline_mode = #tpu.pipeline_mode<synchronous>, transform_indices = @transform_2, window_bounds = array<i64: 1, 128>}, {pipeline_mode = #tpu.pipeline_mode<synchronous>, transform_indices = @transform_3, window_bounds = array<i64: 128, 128>}, {pipeline_mode = #tpu.pipeline_mode<synchronous>, transform_indices = @transform_4, window_bounds = array<i64: 1, 128>}, {pipeline_mode = #tpu.pipeline_mode<synchronous>, transform_indices = @transform_5, window_bounds = array<i64: 128, 128>}, {pipeline_mode = #tpu.pipeline_mode<synchronous>, transform_indices = @transform_6, window_bounds = array<i64: 1, 128>}, {transform_indices = @transform_7, window_bounds = array<i64: 16, 128>}]} {
    %c0 = arith.constant 0 : index
    %c0_0 = arith.constant 0 : index
    %0 = vector.load %arg1[%c0, %c0_0] : memref<16x32xf32, #tpu.memory_space<vmem>>, vector<16x32xf32>
    %1 = arith.truncf %0 : vector<16x32xf32> to vector<16x32xbf16>
    %c0_1 = arith.constant 0 : index
    %c0_2 = arith.constant 0 : index
    %2 = vector.load %arg2[%c0_1, %c0_2] : memref<32x128xbf16, #tpu.memory_space<vmem>>, vector<32x128xbf16>
    %c0_3 = arith.constant 0 : index
    %c0_4 = arith.constant 0 : index
    %3 = vector.load %arg3[%c0_3, %c0_4] : memref<1x128xf32, #tpu.memory_space<vmem>>, vector<1x128xf32>
    %cst = arith.constant dense<0.000000e+00> : vector<16x128xf32>
    %4 = tpu.matmul %1, %2, %cst {dimension_numbers = #tpu.dot_dimension_numbers<[1], [0], [0], [1], [0, 0, 1, 1], [], []>} : vector<16x32xbf16>, vector<32x128xbf16>, vector<16x128xf32> -> vector<16x128xf32>
    %5 = vector.broadcast %3 : vector<1x128xf32> to vector<16x128xf32>
    %6 = arith.addf %4, %5 : vector<16x128xf32>
    %cst_5 = arith.constant 0.000000e+00 : f32
    %cst_6 = arith.constant 6.000000e+00 : f32
    %7 = vector.broadcast %cst_5 : f32 to vector<16x128xf32>
    %8 = arith.maximumf %7, %6 : vector<16x128xf32>
    %9 = vector.broadcast %cst_6 : f32 to vector<16x128xf32>
    %10 = arith.minimumf %9, %8 : vector<16x128xf32>
    %11 = arith.truncf %10 : vector<16x128xf32> to vector<16x128xbf16>
    %c0_7 = arith.constant 0 : index
    %c0_8 = arith.constant 0 : index
    %12 = vector.load %arg4[%c0_7, %c0_8] : memref<128x128xbf16, #tpu.memory_space<vmem>>, vector<128x128xbf16>
    %c0_9 = arith.constant 0 : index
    %c0_10 = arith.constant 0 : index
    %13 = vector.load %arg5[%c0_9, %c0_10] : memref<1x128xf32, #tpu.memory_space<vmem>>, vector<1x128xf32>
    %cst_11 = arith.constant dense<0.000000e+00> : vector<16x128xf32>
    %14 = tpu.matmul %11, %12, %cst_11 {dimension_numbers = #tpu.dot_dimension_numbers<[1], [0], [0], [1], [0, 0, 1, 1], [], []>} : vector<16x128xbf16>, vector<128x128xbf16>, vector<16x128xf32> -> vector<16x128xf32>
    %15 = vector.broadcast %13 : vector<1x128xf32> to vector<16x128xf32>
    %16 = arith.addf %14, %15 : vector<16x128xf32>
    %cst_12 = arith.constant 0.000000e+00 : f32
    %cst_13 = arith.constant 6.000000e+00 : f32
    %17 = vector.broadcast %cst_12 : f32 to vector<16x128xf32>
    %18 = arith.maximumf %17, %16 : vector<16x128xf32>
    %19 = vector.broadcast %cst_13 : f32 to vector<16x128xf32>
    %20 = arith.minimumf %19, %18 : vector<16x128xf32>
    %21 = arith.truncf %20 : vector<16x128xf32> to vector<16x128xbf16>
    %c0_14 = arith.constant 0 : index
    %c0_15 = arith.constant 0 : index
    %22 = vector.load %arg6[%c0_14, %c0_15] : memref<128x128xbf16, #tpu.memory_space<vmem>>, vector<128x128xbf16>
    %c0_16 = arith.constant 0 : index
    %c0_17 = arith.constant 0 : index
    %23 = vector.load %arg7[%c0_16, %c0_17] : memref<1x128xf32, #tpu.memory_space<vmem>>, vector<1x128xf32>
    %cst_18 = arith.constant dense<0.000000e+00> : vector<16x128xf32>
    %24 = tpu.matmul %21, %22, %cst_18 {dimension_numbers = #tpu.dot_dimension_numbers<[1], [0], [0], [1], [0, 0, 1, 1], [], []>} : vector<16x128xbf16>, vector<128x128xbf16>, vector<16x128xf32> -> vector<16x128xf32>
    %25 = vector.broadcast %23 : vector<1x128xf32> to vector<16x128xf32>
    %26 = arith.addf %24, %25 : vector<16x128xf32>
    %c0_19 = arith.constant 0 : index
    %c0_20 = arith.constant 0 : index
    %27 = vector.load %arg8[%c0_19, %c0_20] : memref<16x128xf32, #tpu.memory_space<vmem>>, vector<16x128xf32>
    tpu.vector_store %arg8[%c0_19, %c0_20], %26 {strides = array<i32>} : memref<16x128xf32, #tpu.memory_space<vmem>>, vector<16x128xf32>,
    return
  }
  func.func @transform_0(%arg0: i32) -> (i32, i32) {
    %c0_i32 = arith.constant 0 : i32
    %c0_i32_0 = arith.constant 0 : i32
    return %arg0, %c0_i32 : i32, i32
  }
  func.func @transform_1(%arg0: i32) -> (i32, i32) {
    %c0_i32 = arith.constant 0 : i32
    %c0_i32_0 = arith.constant 0 : i32
    %c0_i32_1 = arith.constant 0 : i32
    return %c0_i32, %c0_i32_0 : i32, i32
  }
  func.func @transform_2(%arg0: i32) -> (i32, i32) {
    %c0_i32 = arith.constant 0 : i32
    %c0_i32_0 = arith.constant 0 : i32
    %c0_i32_1 = arith.constant 0 : i32
    return %c0_i32, %c0_i32_0 : i32, i32
  }
  func.func @transform_3(%arg0: i32) -> (i32, i32) {
    %c0_i32 = arith.constant 0 : i32
    %c0_i32_0 = arith.constant 0 : i32
    %c0_i32_1 = arith.constant 0 : i32
    return %c0_i32, %c0_i32_0 : i32, i32
  }
  func.func @transform_4(%arg0: i32) -> (i32, i32) {
    %c0_i32 = arith.constant 0 : i32
    %c0_i32_0 = arith.constant 0 : i32
    %c0_i32_1 = arith.constant 0 : i32
    return %c0_i32, %c0_i32_0 : i32, i32
  }
  func.func @transform_5(%arg0: i32) -> (i32, i32) {
    %c0_i32 = arith.constant 0 : i32
    %c0_i32_0 = arith.constant 0 : i32
    %c0_i32_1 = arith.constant 0 : i32
    return %c0_i32, %c0_i32_0 : i32, i32
  }
  func.func @transform_6(%arg0: i32) -> (i32, i32) {
    %c0_i32 = arith.constant 0 : i32
    %c0_i32_0 = arith.constant 0 : i32
    %c0_i32_1 = arith.constant 0 : i32
    return %c0_i32, %c0_i32_0 : i32, i32
  }
  func.func @transform_7(%arg0: i32) -> (i32, i32) {
    %c0_i32 = arith.constant 0 : i32
    %c0_i32_0 = arith.constant 0 : i32
    return %arg0, %c0_i32 : i32, i32
  }
}

</mosaic_0001>

<bundles_post_ra>
// kernel: run.1
= control target key start
LH: loop header
LB: loop body
LE: loop exit
PB: predicated region body
PF: predicated region fallthrough
CT: control target
= control target key end

     0   :  { %12 = vsyncpa [#allocation3], 0  ;;  %s593_s0 = inlined_call_operand.hbm [shape: f32[16,32], index: 0, kind: input, shape index: {}]   ;;  %s594_s1 = inlined_call_operand.hbm [shape: bf16[32,128], index: 1, kind: input, shape index: {}]   ;;  %s595_s2 = inlined_call_operand.vmem [shape: f32[1,128], index: 2, kind: input, shape index: {}]   ;;  %s596_s3 = inlined_call_operand.hbm [shape: bf16[128,128], index: 3, kind: input, shape index: {}]   ;;  %s597_s4 = inlined_call_operand.vmem [shape: f32[1,128], index: 4, kind: input, shape index: {}]   ;;  %s598_s5 = inlined_call_operand.hbm [shape: bf16[128,128], index: 5, kind: input, shape index: {}]   ;;  %s599_s6 = inlined_call_operand.vmem [shape: f32[1,128], index: 6, kind: input, shape index: {}]   ;;  %s600_s7 = inlined_call_operand.vmem [shape: f32[16,128], index: 7, kind: output, shape index: {}]  }
   0x1   :  { %13 = vsyncpa [#allocation5], 0  ;;  %s32_s26 = sshll.u32 %s594_s1, 4  ;;  %s33_s26 = int_to_ptr.hbm [resolvable:$true] %s32_s26 }
   0x2   :  { %14 = vsyncpa [#allocation8], 0  ;;  %s518_s27 = smov [#allocation4]   ;;  %s19_s8 = sshll.u32 %s593_s0, 4  ;;  %s20_s8 = int_to_ptr.hbm [resolvable:$true] %s19_s8 }
   0x3   :  { %s34_s28 = sshll.u32 %s518_s27, 4  ;;  %s519_s9 = smov 64   ;;  %s35_s28 = int_to_ptr.vmem [resolvable:$true] %s34_s28 }
   0x4   :  { %s520_s10 = smov 4   ;;  %s521_s11 = smov [#allocation2]  }
   0x5   :  { %40 = dma.hbm_to_vmem [thread:$0]  %s33_s26, 256, %s35_s28, [#allocation5], %s519_s9, %s519_s9, %s520_s10  }
   0x6   :  { %s21_s12 = sshll.u32 %s521_s11, 4  ;;  %s522_s13 = smov 128   ;;  %s22_s12 = int_to_ptr.vmem [resolvable:$true] %s21_s12 }
   0x7   :  { %s523_s14 = smov 8   ;;  %s47_s16 = sshll.u32 %s596_s3, 4  ;;  %s48_s16 = int_to_ptr.hbm [resolvable:$true] %s47_s16 }
   0x8   :  { %27 = dma.hbm_to_vmem [thread:$0]  %s20_s8, 256, %s22_s12, [#allocation3], %s522_s13, %s522_s13, %s523_s14  }
   0x9   :  { %s524_s17 = smov [#allocation6]   ;;  %s62_s20 = sshll.u32 %s598_s5, 4  ;;  %s63_s20 = int_to_ptr.hbm [resolvable:$true] %s62_s20 }
   0xa   :  { %s49_s18 = sshll.u32 %s524_s17, 4  ;;  %s525_s21 = smov [#allocation7]   ;;  %s50_s18 = int_to_ptr.vmem [resolvable:$true] %s49_s18 }
   0xb   :  { %55 = dma.hbm_to_vmem [thread:$0]  %s48_s16, 1024, %s50_s18, [#allocation5], %s519_s9, %s519_s9, %s520_s10  }
   0xc   :  { %s64_s22 = sshll.u32 %s525_s21, 4  ;;  %s65_s22 = int_to_ptr.vmem [resolvable:$true] %s64_s22 }
   0xd   :  { %70 = dma.hbm_to_vmem [thread:$0]  %s63_s20, 1024, %s65_s22, [#allocation8], %s519_s9, %s519_s9, %s520_s10  }
   0xe   :  { %512 = dma.done.wait [#allocation3], 256  }
   0xf   :  { %513 = vsyncadd [#allocation3], 4294967040 }
  0x10   :  { %514 = dma.done.wait [#allocation5], 1280  }
  0x11   :  { %515 = vsyncadd [#allocation5], 4294966016 }
  0x12   :  { %516 = dma.done.wait [#allocation8], 1024  }
  0x13   :  { %517 = vsyncadd [#allocation8], 4294966272  ;;  %v388_v0 = vld [vmem:[#allocation4 + $0x8] sm:$0xff]  ;;  %v387_v1 = vld [vmem:[#allocation4] sm:$0xff]  ;;  %vm113_vm0 = vcmask 261120  }
  0x14   :  { %v396_v2 = vld [vmem:[#allocation6 + $0x38] sm:$0xff]  ;;  %123 = vmatpush.bf16.msra.mxu0 %v388_v0  ;;  %v90_v3 = vld [vmem:[#allocation2] sm:$0xff]  ;;  %v91_v4 = vld [vmem:[#allocation2 + $0x8] sm:$0xff] }
  0x15   :  { %204 = vmatpush.bf16.msra.mxu1 %v396_v2  ;;  %v395_v5 = vld [vmem:[#allocation6 + $0x30] sm:$0xff]  ;;  %v92_v6 = vpack.c.bf16 %v91_v4, %v90_v3  ;;  %v394_v7 = vld [vmem:[#allocation6 + $0x28] sm:$0xff]  ;;  %v393_v8 = vld [vmem:[#allocation6 + $0x20] sm:$0xff] }
  0x16   :  { %v392_v9 = vld [vmem:[#allocation6 + $0x18] sm:$0xff]  ;;  %v391_v10 = vld [vmem:[#allocation6 + $0x10] sm:$0xff]  ;;  %v390_v11 = vld [vmem:[#allocation6 + $0x8] sm:$0xff] }
  0x17   :  { %v389_v12 = vld [vmem:[#allocation6] sm:$0xff]  ;;  %v404_v13 = vld [vmem:[#allocation7 + $0x38] sm:$0xff]  ;;  %v403_v14 = vld [vmem:[#allocation7 + $0x30] sm:$0xff] }
  0x18   :  { %124 = vmatpush.bf16.msra.mxu0 %v387_v1  ;;  %291 = vmatpush.bf16.msra.mxu2 %v404_v13  ;;  %v402_v15 = vld [vmem:[#allocation7 + $0x28] sm:$0xff]  ;;  %v401_v16 = vld [vmem:[#allocation7 + $0x20] sm:$0xff]  ;;  %v400_v27 = vld [vmem:[#allocation7 + $0x18] sm:$0xff] }
  0x19   :  { %205 = vmatpush.bf16.msra.mxu1 %v395_v5  ;;  %v413_v18 = vld [vmem:[%s595_s2] ss:$0 sm:$0xff]  ;;  %v399_v28 = vld [vmem:[#allocation7 + $0x10] sm:$0xff]  ;;  %v398_v29 = vld [vmem:[#allocation7 + $0x8] sm:$0xff] }
  0x1a   :  { %v397_v30 = vld [vmem:[#allocation7] sm:$0xff] }
  0x1b   :  { %322 = vmatmul.msk.bf16.vlgmr.msra.gmra.mxu0 %vm113_vm0, %v92_v6  ;;  %v414_v32 = vld [vmem:[%s597_s4] ss:$0 sm:$0xff] }
  0x1c   :  { %292 = vmatpush.bf16.msra.mxu2 %v403_v14  ;;  %v415_v41 = vld [vmem:[%s599_s6] ss:$0 sm:$0xff] }
  0x1d   :  { %206 = vmatpush.bf16.msra.mxu1 %v394_v7 }
  0x20   :  { %293 = vmatpush.bf16.msra.mxu2 %v402_v15 }
  0x21   :  { %207 = vmatpush.bf16.msra.mxu1 %v393_v8 }
  0x24   :  { %294 = vmatpush.bf16.msra.mxu2 %v401_v16 }
  0x25   :  { %208 = vmatpush.bf16.msra.mxu1 %v392_v9 }
  0x28   :  { %295 = vmatpush.bf16.msra.mxu2 %v400_v27 }
  0x29   :  { %209 = vmatpush.bf16.msra.mxu1 %v391_v10 }
  0x2c   :  { %296 = vmatpush.bf16.msra.mxu2 %v399_v28 }
  0x2d   :  { %210 = vmatpush.bf16.msra.mxu1 %v390_v11 }
  0x30   :  { %297 = vmatpush.bf16.msra.mxu2 %v398_v29 }
  0x31   :  { %211 = vmatpush.bf16.msra.mxu1 %v389_v12 }
  0x34   :  { %298 = vmatpush.bf16.msra.mxu2 %v397_v30 }
  0x98   :  { %v126_v17 = vpop.f32.mrf.mxu0 }
  0x99   :  { %v127_v19 = vadd.f32 %v413_v18, %v126_v17 }
  0x9b   :  { %v131_v21 = vmax.f32 %v127_v19, 0.0 }
  0x9d   :  { %v133_v24 = vmin.f32 %v131_v21, 6.0 }
  0xa0   :  { %v128_v20 = vpop.f32.mrf.mxu0 }
  0xa1   :  { %v129_v22 = vadd.f32 %v413_v18, %v128_v20 }
  0xa3   :  { %v132_v23 = vmax.f32 %v129_v22, 0.0 }
  0xa5   :  { %v134_v25 = vmin.f32 %v132_v23, 6.0 }
  0xa7   :  { %v135_v26 = vpack.c.bf16 %v134_v25, %v133_v24 }
  0xa9   :  { %212 = vmatmul.bf16.vlgmr.msra.gmra.mxu1 %v135_v26 }
 0x126   :  { %v213_v31 = vpop.f32.mrf.mxu1 }
 0x127   :  { %v214_v33 = vadd.f32 %v414_v32, %v213_v31 }
 0x129   :  { %v218_v35 = vmax.f32 %v214_v33, 0.0 }
 0x12b   :  { %v220_v38 = vmin.f32 %v218_v35, 6.0 }
 0x12e   :  { %v215_v34 = vpop.f32.mrf.mxu1 }
 0x12f   :  { %v216_v36 = vadd.f32 %v414_v32, %v215_v34 }
 0x131   :  { %v219_v37 = vmax.f32 %v216_v36, 0.0 }
 0x133   :  { %v221_v39 = vmin.f32 %v219_v37, 6.0 }
 0x135   :  { %v222_v40 = vpack.c.bf16 %v221_v39, %v220_v38 }
 0x137   :  { %299 = vmatmul.bf16.vlgmr.msra.gmra.mxu2 %v222_v40 }
 0x1ba   :  { %v300_v42 = vpop.f32.mrf.mxu2 }
 0x1bb   :  { %v301_v43 = vadd.f32 %v415_v41, %v300_v42 }
 0x1bd   :  { %305 = vst [vmem:[%s600_s7] sm:$0xff] %v301_v43 }
 0x1c2   :  { %v302_v44 = vpop.f32.mrf.mxu2 }
 0x1c3   :  { %v303_v45 = vadd.f32 %v415_v41, %v302_v44 }
 0x1c5   :  { %306 = vst [vmem:[%s600_s7 + $0x8] sm:$0xff] %v303_v45 }
 0x1c6   :  { %311 = vsyncpa [#allocation3], 1 }
 0x1c7   :  { %312 = vsyncpa [#allocation5], 1 }
 0x1c8   :  { %313 = vsyncpa [#allocation8], 1 }

// kernel: run.1
= control target key start
LH: loop header
LB: loop body
LE: loop exit
PB: predicated region body
PF: predicated region fallthrough
CT: control target
= control target key end

     0   :  { %12 = vsyncpa [#allocation3], 0  ;;  %s593_s0 = inlined_call_operand.hbm [shape: f32[16,32], index: 0, kind: input, shape index: {}]   ;;  %s594_s1 = inlined_call_operand.hbm [shape: bf16[32,128], index: 1, kind: input, shape index: {}]   ;;  %s595_s2 = inlined_call_operand.vmem [shape: f32[1,128], index: 2, kind: input, shape index: {}]   ;;  %s596_s3 = inlined_call_operand.hbm [shape: bf16[128,128], index: 3, kind: input, shape index: {}]   ;;  %s597_s4 = inlined_call_operand.vmem [shape: f32[1,128], index: 4, kind: input, shape index: {}]   ;;  %s598_s5 = inlined_call_operand.hbm [shape: bf16[128,128], index: 5, kind: input, shape index: {}]   ;;  %s599_s6 = inlined_call_operand.vmem [shape: f32[1,128], index: 6, kind: input, shape index: {}]   ;;  %s600_s7 = inlined_call_operand.vmem [shape: f32[16,128], index: 7, kind: output, shape index: {}]  }
   0x1   :  { %13 = vsyncpa [#allocation5], 0  ;;  %s32_s26 = sshll.u32 %s594_s1, 4  ;;  %s33_s26 = int_to_ptr.hbm [resolvable:$true] %s32_s26 }
   0x2   :  { %14 = vsyncpa [#allocation8], 0  ;;  %s518_s27 = smov [#allocation4]   ;;  %s19_s8 = sshll.u32 %s593_s0, 4  ;;  %s20_s8 = int_to_ptr.hbm [resolvable:$true] %s19_s8 }
   0x3   :  { %s34_s28 = sshll.u32 %s518_s27, 4  ;;  %s519_s9 = smov 64   ;;  %s35_s28 = int_to_ptr.vmem [resolvable:$true] %s34_s28 }
   0x4   :  { %s520_s10 = smov 4   ;;  %s521_s11 = smov [#allocation2]  }
   0x5   :  { %40 = dma.hbm_to_vmem [thread:$0]  %s33_s26, 256, %s35_s28, [#allocation5], %s519_s9, %s519_s9, %s520_s10  }
   0x6   :  { %s21_s12 = sshll.u32 %s521_s11, 4  ;;  %s522_s13 = smov 128   ;;  %s22_s12 = int_to_ptr.vmem [resolvable:$true] %s21_s12 }
   0x7   :  { %s523_s14 = smov 8   ;;  %s47_s16 = sshll.u32 %s596_s3, 4  ;;  %s48_s16 = int_to_ptr.hbm [resolvable:$true] %s47_s16 }
   0x8   :  { %27 = dma.hbm_to_vmem [thread:$0]  %s20_s8, 256, %s22_s12, [#allocation3], %s522_s13, %s522_s13, %s523_s14  }
   0x9   :  { %s524_s17 = smov [#allocation6]   ;;  %s62_s20 = sshll.u32 %s598_s5, 4  ;;  %s63_s20 = int_to_ptr.hbm [resolvable:$true] %s62_s20 }
   0xa   :  { %s49_s18 = sshll.u32 %s524_s17, 4  ;;  %s525_s21 = smov [#allocation7]   ;;  %s50_s18 = int_to_ptr.vmem [resolvable:$true] %s49_s18 }
   0xb   :  { %55 = dma.hbm_to_vmem [thread:$0]  %s48_s16, 1024, %s50_s18, [#allocation5], %s519_s9, %s519_s9, %s520_s10  }
   0xc   :  { %s64_s22 = sshll.u32 %s525_s21, 4  ;;  %s65_s22 = int_to_ptr.vmem [resolvable:$true] %s64_s22 }
   0xd   :  { %70 = dma.hbm_to_vmem [thread:$0]  %s63_s20, 1024, %s65_s22, [#allocation8], %s519_s9, %s519_s9, %s520_s10  }
   0xe   :  { %512 = dma.done.wait [#allocation3], 256  }
   0xf   :  { %513 = vsyncadd [#allocation3], 4294967040 }
  0x10   :  { %514 = dma.done.wait [#allocation5], 1280  }
  0x11   :  { %515 = vsyncadd [#allocation5], 4294966016 }
  0x12   :  { %516 = dma.done.wait [#allocation8], 1024  }
  0x13   :  { %517 = vsyncadd [#allocation8], 4294966272  ;;  %v388_v0 = vld [vmem:[#allocation4 + $0x8] sm:$0xff]  ;;  %v387_v1 = vld [vmem:[#allocation4] sm:$0xff]  ;;  %vm113_vm0 = vcmask 261120  }
  0x14   :  { %v396_v2 = vld [vmem:[#allocation6 + $0x38] sm:$0xff]  ;;  %123 = vmatpush.bf16.msra.mxu0 %v388_v0  ;;  %v90_v3 = vld [vmem:[#allocation2] sm:$0xff]  ;;  %v91_v4 = vld [vmem:[#allocation2 + $0x8] sm:$0xff] }
  0x15   :  { %204 = vmatpush.bf16.msra.mxu1 %v396_v2  ;;  %v395_v5 = vld [vmem:[#allocation6 + $0x30] sm:$0xff]  ;;  %v92_v6 = vpack.c.bf16 %v91_v4, %v90_v3  ;;  %v394_v7 = vld [vmem:[#allocation6 + $0x28] sm:$0xff]  ;;  %v393_v8 = vld [vmem:[#allocation6 + $0x20] sm:$0xff] }
  0x16   :  { %v392_v9 = vld [vmem:[#allocation6 + $0x18] sm:$0xff]  ;;  %v391_v10 = vld [vmem:[#allocation6 + $0x10] sm:$0xff]  ;;  %v390_v11 = vld [vmem:[#allocation6 + $0x8] sm:$0xff] }
  0x17   :  { %v389_v12 = vld [vmem:[#allocation6] sm:$0xff]  ;;  %v404_v13 = vld [vmem:[#allocation7 + $0x38] sm:$0xff]  ;;  %v403_v14 = vld [vmem:[#allocation7 + $0x30] sm:$0xff] }
  0x18   :  { %124 = vmatpush.bf16.msra.mxu0 %v387_v1  ;;  %291 = vmatpush.bf16.msra.mxu2 %v404_v13  ;;  %v402_v15 = vld [vmem:[#allocation7 + $0x28] sm:$0xff]  ;;  %v401_v16 = vld [vmem:[#allocation7 + $0x20] sm:$0xff]  ;;  %v400_v27 = vld [vmem:[#allocation7 + $0x18] sm:$0xff] }
  0x19   :  { %205 = vmatpush.bf16.msra.mxu1 %v395_v5  ;;  %v413_v18 = vld [vmem:[%s595_s2] ss:$0 sm:$0xff]  ;;  %v399_v28 = vld [vmem:[#allocation7 + $0x10] sm:$0xff]  ;;  %v398_v29 = vld [vmem:[#allocation7 + $0x8] sm:$0xff] }
  0x1a   :  { %v397_v30 = vld [vmem:[#allocation7] sm:$0xff] }
  0x1b   :  { %322 = vmatmul.msk.bf16.vlgmr.msra.gmra.mxu0 %vm113_vm0, %v92_v6  ;;  %v414_v32 = vld [vmem:[%s597_s4] ss:$0 sm:$0xff] }
  0x1c   :  { %292 = vmatpush.bf16.msra.mxu2 %v403_v14  ;;  %v415_v41 = vld [vmem:[%s599_s6] ss:$0 sm:$0xff] }
  0x1d   :  { %206 = vmatpush.bf16.msra.mxu1 %v394_v7 }
  0x20   :  { %293 = vmatpush.bf16.msra.mxu2 %v402_v15 }
  0x21   :  { %207 = vmatpush.bf16.msra.mxu1 %v393_v8 }
  0x24   :  { %294 = vmatpush.bf16.msra.mxu2 %v401_v16 }
  0x25   :  { %208 = vmatpush.bf16.msra.mxu1 %v392_v9 }
  0x28   :  { %295 = vmatpush.bf16.msra.mxu2 %v400_v27 }
  0x29   :  { %209 = vmatpush.bf16.msra.mxu1 %v391_v10 }
  0x2c   :  { %296 = vmatpush.bf16.msra.mxu2 %v399_v28 }
  0x2d   :  { %210 = vmatpush.bf16.msra.mxu1 %v390_v11 }
  0x30   :  { %297 = vmatpush.bf16.msra.mxu2 %v398_v29 }
  0x31   :  { %211 = vmatpush.bf16.msra.mxu1 %v389_v12 }
  0x34   :  { %298 = vmatpush.bf16.msra.mxu2 %v397_v30 }
  0x98   :  { %v126_v17 = vpop.f32.mrf.mxu0 }
  0x99   :  { %v127_v19 = vadd.f32 %v413_v18, %v126_v17 }
  0x9b   :  { %v131_v21 = vmax.f32 %v127_v19, 0.0 }
  0x9d   :  { %v133_v24 = vmin.f32 %v131_v21, 6.0 }
  0xa0   :  { %v128_v20 = vpop.f32.mrf.mxu0 }
  0xa1   :  { %v129_v22 = vadd.f32 %v413_v18, %v128_v20 }
  0xa3   :  { %v132_v23 = vmax.f32 %v129_v22, 0.0 }
  0xa5   :  { %v134_v25 = vmin.f32 %v132_v23, 6.0 }
  0xa7   :  { %v135_v26 = vpack.c.bf16 %v134_v25, %v133_v24 }
  0xa9   :  { %212 = vmatmul.bf16.vlgmr.msra.gmra.mxu1 %v135_v26 }
 0x126   :  { %v213_v31 = vpop.f32.mrf.mxu1 }
 0x127   :  { %v214_v33 = vadd.f32 %v414_v32, %v213_v31 }
 0x129   :  { %v218_v35 = vmax.f32 %v214_v33, 0.0 }
 0x12b   :  { %v220_v38 = vmin.f32 %v218_v35, 6.0 }
 0x12e   :  { %v215_v34 = vpop.f32.mrf.mxu1 }
 0x12f   :  { %v216_v36 = vadd.f32 %v414_v32, %v215_v34 }
 0x131   :  { %v219_v37 = vmax.f32 %v216_v36, 0.0 }
 0x133   :  { %v221_v39 = vmin.f32 %v219_v37, 6.0 }
 0x135   :  { %v222_v40 = vpack.c.bf16 %v221_v39, %v220_v38 }
 0x137   :  { %299 = vmatmul.bf16.vlgmr.msra.gmra.mxu2 %v222_v40 }
 0x1ba   :  { %v300_v42 = vpop.f32.mrf.mxu2 }
 0x1bb   :  { %v301_v43 = vadd.f32 %v415_v41, %v300_v42 }
 0x1bd   :  { %305 = vst [vmem:[%s600_s7] sm:$0xff] %v301_v43 }
 0x1c2   :  { %v302_v44 = vpop.f32.mrf.mxu2 }
 0x1c3   :  { %v303_v45 = vadd.f32 %v415_v41, %v302_v44 }
 0x1c5   :  { %306 = vst [vmem:[%s600_s7 + $0x8] sm:$0xff] %v303_v45 }
 0x1c6   :  { %311 = vsyncpa [#allocation3], 1 }
 0x1c7   :  { %312 = vsyncpa [#allocation5], 1 }
 0x1c8   :  { %313 = vsyncpa [#allocation8], 1 }

</bundles_post_ra>
